<compile_context>
chip_gen: v5e
topology: v5e:2x2
jax: 0.10.0
libtpu: 0.0.40
codegen_flags: <defaults>
</compile_context>

<pallas_src>
import functools

import jax
import jax.numpy as jnp
from jax.experimental import pallas as pl
from jax.experimental.pallas import tpu as pltpu


def _bilinear_interp_matrix(out_size: int, in_size: int) -> jnp.ndarray:
    """Row-interpolation matrix M (out_size, in_size) s.t. out = M @ in.

    Matches PyTorch / torchvision bilinear with align_corners=False
    (half-pixel centers, source index clamped to >= 0).  Built from two
    one-hot masks (no in_size x in_size eye gather).
    """
    scale = in_size / out_size
    dst = jnp.arange(out_size, dtype=jnp.float32)
    src = jnp.maximum((dst + 0.5) * scale - 0.5, 0.0)
    x0f = jnp.floor(src)
    lam = src - x0f
    x0 = x0f.astype(jnp.int32)
    x1 = jnp.minimum(x0 + 1, in_size - 1)
    cols = jnp.arange(in_size, dtype=jnp.int32)[None, :]             # (1, in)
    w_lo = jnp.where(cols == x0[:, None], (1.0 - lam)[:, None], 0.0)  # (out, in)
    w_hi = jnp.where(cols == x1[:, None], lam[:, None], 0.0)          # (out, in)
    return w_lo + w_hi


def _round_up(x: int, q: int) -> int:
    return -(-x // q) * q


def _tpu_generation():
    """Returns (vmem_bytes_per_core, mxu_granularity, tensorcores_per_chip)."""
    kind = ""
    try:
        kind = jax.devices()[0].device_kind.lower()
    except Exception:
        pass
    vmem = None
    try:
        vmem = getattr(pltpu.get_tpu_info(), "vmem_capacity_bytes", None)
    except Exception:
        vmem = None
    if not vmem:
        vmem = 64 * 1024 * 1024 if ("v7" in kind or "7x" in kind) else 128 * 1024 * 1024
    mxu = 256 if ("v6" in kind or "v7" in kind or "7x" in kind) else 128
    cores = 2 if any(t in kind for t in ("v7", "7x", "v4", "v5p")) else 1
    return int(vmem), mxu, cores


def _pick_batch(nc: int, per_plane_bytes: int, budget: int, num_cores: int) -> int:
    """Largest per-step plane batch fitting `budget`.

    Preference order: (a) step count a multiple of the TensorCore count and
    >= 2 steps per core (megacore balance + per-core double buffering),
    (b) >= 2 steps (pipeline overlap), (c) anything feasible.  bsz need not
    divide nc: the grid uses cdiv and a ragged last block.
    """
    max_fit = max(1, min(nc, budget // max(per_plane_bytes, 1)))
    cands = list(range(1, max_fit + 1))
    steps = lambda b: -(-nc // b)
    tiers = []
    if num_cores > 1:
        tiers.append([b for b in cands
                      if steps(b) % num_cores == 0 and steps(b) >= 2 * num_cores])
    tiers.append([b for b in cands if steps(b) >= 2])
    tiers.append(cands)
    for tier in tiers:
        if tier:
            return max(tier)
    return 1


def _resize_kernel(wy_ref, wxt_ref, img_ref, out_ref, *, h_c, w_c, rows_first, unroll):
    # wy_ref:  (H, h_c)          row interpolation matrix (constant across grid)
    # wxt_ref: (w_c, W)          transposed column interpolation matrix (constant)
    # img_ref: (B, h_blk, w_blk) padded upper-left windows of B planes
    # out_ref: (B, H, W)
    #
    # Planes are processed one at a time so no broadcast copy of Wy and no
    # (B, H, w_c) intermediate is ever materialized; the only live temporary
    # is one plane's f32 intermediate + accumulator.
    cdt = wy_ref.dtype
    bsz = out_ref.shape[0]

    def plane(b, carry):
        crop = img_ref[b, :h_c, :w_c].astype(cdt)                     # fused crop (h_c, w_c)
        if rows_first:
            tmp = jnp.dot(wy_ref[...], crop,
                          preferred_element_type=jnp.float32)          # (H, w_c)
            out = jnp.dot(tmp.astype(cdt), wxt_ref[...],
                          preferred_element_type=jnp.float32)          # (H, W)
        else:
            tmp = jnp.dot(crop, wxt_ref[...],
                          preferred_element_type=jnp.float32)          # (h_c, W)
            out = jnp.dot(wy_ref[...], tmp.astype(cdt),
                          preferred_element_type=jnp.float32)          # (H, W)
        out_ref[b] = out.astype(out_ref.dtype)
        return carry

    jax.lax.fori_loop(0, bsz, plane, 0, unroll=unroll)


@functools.partial(jax.jit, static_argnames=("crop_size", "use_bf16"))
def upper_left_crop_with_resize_back(image: jnp.ndarray, crop_size: float,
                                     use_bf16: bool = True) -> jnp.ndarray:
    """image: (N, C, H, W) float array. Returns (N, C, H, W).

    use_bf16=True runs the MXU matmuls with bf16 inputs / f32 accumulation
    (~3-4x throughput on v6e/v7x); results can differ from torchvision's f32
    bilinear by up to ~1e-2 relative error (fine for augmentation).  Pass
    use_bf16=False for f32 arithmetic matching the reference closely.
    """
    n, c, h, w = image.shape
    nc = n * c
    h_c = max(1, min(h, int(crop_size * h)))
    w_c = max(1, min(w, int(crop_size * w)))

    compute_dtype = jnp.bfloat16 if use_bf16 else jnp.float32
    wy = _bilinear_interp_matrix(h, h_c).astype(compute_dtype)       # (H, h_c)
    wxt = _bilinear_interp_matrix(w, w_c).T.astype(compute_dtype)    # (w_c, W)

    planes = image.reshape(nc, h, w)                                 # free reshape

    # Fused-crop input block: crop extents padded up to (8, 128) tiling, clamped to (H, W).
    h_blk = min(h, _round_up(h_c, 8))
    w_blk = min(w, _round_up(w_c, 128))

    vmem_cap, mxu, num_cores = _tpu_generation()

    # Matmul order: minimize MXU-padded tile cost (K/N rounded to the MXU dim,
    # M to the 8-sublane granule); ties go to cols-first (lane-dense N = W).
    cost_rows = (_round_up(h, 8) * _round_up(h_c, mxu) * _round_up(w_c, mxu)
                 + _round_up(h, 8) * _round_up(w_c, mxu) * _round_up(w, mxu))
    cost_cols = (_round_up(h_c, 8) * _round_up(w_c, mxu) * _round_up(w, mxu)
                 + _round_up(h, 8) * _round_up(h_c, mxu) * _round_up(w, mxu))
    rows_first = cost_rows < cost_cols

    # Generation-aware VMEM budgeting: pack into ~60% of physical VMEM, scoped
    # limit at 75% (>= 25% headroom for compiler scratch / spills).
    in_item = image.dtype.itemsize
    c_item = jnp.dtype(compute_dtype).itemsize
    per_plane_bytes = (2 * h_blk * w_blk * in_item       # input window (double-buffered)
                       + 2 * h * w * in_item)            # output plane (double-buffered)
    weight_bytes = 2 * (h * h_c + w_c * w) * c_item      # constant weights (2 pipeline bufs)
    mid = max(h * w_c, h_c * w)
    scratch_bytes = (h_c * w_c * c_item                  # one plane's crop
                     + mid * (4 + c_item)                # f32 intermediate + cast copy
                     + h * w * 4)                        # f32 accumulator before cast
    vmem_budget = int(vmem_cap * 0.6)
    vmem_limit = int(vmem_cap * 0.75)
    budget = max(vmem_budget - weight_bytes - scratch_bytes, per_plane_bytes)
    bsz = _pick_batch(nc, per_plane_bytes, budget, num_cores)
    steps = pl.cdiv(nc, bsz)                             # ragged last block handled by Pallas

    flops_per_plane = 2 * ((h * h_c * w_c + h * w_c * w) if rows_first
                           else (h_c * w_c * w + h * h_c * w))
    cost = pl.CostEstimate(
        flops=nc * flops_per_plane,
        transcendentals=0,
        bytes_accessed=(nc * (h_blk * w_blk + h * w) * in_item
                        + (h * h_c + w_c * w) * c_item
                        + 2 * nc * mid * 4),             # f32 intermediate traffic
    )

    kernel = functools.partial(_resize_kernel, h_c=h_c, w_c=w_c,
                               rows_first=rows_first, unroll=bool(bsz <= 8))

    out = pl.pallas_call(
        kernel,
        out_shape=jax.ShapeDtypeStruct((nc, h, w), image.dtype),
        grid=(steps,),
        in_specs=[
            pl.BlockSpec((h, h_c), lambda i: (0, 0)),                # Wy (fetched once)
            pl.BlockSpec((w_c, w), lambda i: (0, 0)),                # Wx^T (fetched once)
            pl.BlockSpec((bsz, h_blk, w_blk), lambda i: (i, 0, 0)),  # fused upper-left crop
        ],
        out_specs=pl.BlockSpec((bsz, h, w), lambda i: (i, 0, 0)),    # lane-dense (full W)
        compiler_params=pltpu.CompilerParams(
            dimension_semantics=("parallel",),
            vmem_limit_bytes=vmem_limit,
        ),
        cost_estimate=cost,
    )(wy, wxt, planes)

    return out.reshape(n, c, h, w)


def _reference(x: jnp.ndarray, crop_size: float) -> jnp.ndarray:
    """Pure-JAX reference (exact bilinear in f32)."""
    n, c, h, w = x.shape
    h_c = max(1, min(h, int(crop_size * h)))
    w_c = max(1, min(w, int(crop_size * w)))
    wy = _bilinear_interp_matrix(h, h_c)
    wxt = _bilinear_interp_matrix(w, w_c).T
    crop = x[..., :h_c, :w_c].astype(jnp.float32)
    out = jnp.einsum("hk,nckw,wo->ncho", wy, crop, wxt)
    return out.astype(x.dtype)


if __name__ == "__main__":
    key = jax.random.PRNGKey(0)
    x = jax.random.uniform(key, (2, 4, 16, 16), dtype=jnp.float32)

    ref = jax.block_until_ready(_reference(x, 0.5))

    # Default (bf16 compute, f32 accumulation).
    y = jax.block_until_ready(upper_left_crop_with_resize_back(x, crop_size=0.5))
    assert y.shape == x.shape, (y.shape, x.shape)
    assert y.dtype == x.dtype, (y.dtype, x.dtype)
    assert bool(jnp.all(jnp.isfinite(y)))
    assert bool(jnp.allclose(y, ref, atol=5e-2, rtol=5e-2))

    # f32 compute path (matches the reference tightly).
    y32 = jax.block_until_ready(upper_left_crop_with_resize_back(x, crop_size=0.5, use_bf16=False))
    assert y32.shape == x.shape
    assert bool(jnp.allclose(y32, ref, atol=1e-3, rtol=1e-3))

    # Odd plane count (N*C = 3) exercises the cdiv grid / ragged last block path.
    x2 = jax.random.uniform(jax.random.PRNGKey(1), (1, 3, 16, 16), dtype=jnp.float32)
    ref2 = jax.block_until_ready(_reference(x2, 0.75))
    y2 = jax.block_until_ready(upper_left_crop_with_resize_back(x2, crop_size=0.75))
    assert y2.shape == x2.shape
    assert bool(jnp.allclose(y2, ref2, atol=5e-2, rtol=5e-2))

    print("KERNEL_OK")
</pallas_src>

<mosaic_0001>
module attributes {stable_mosaic.version = 11 : i64} {
  func.func @_resize_kernel(%arg0: i32, %arg1: memref<16x8xbf16, #tpu.memory_space<vmem>>, %arg2: memref<8x16xbf16, #tpu.memory_space<vmem>>, %arg3: memref<7x8x16xf32, #tpu.memory_space<vmem>>, %arg4: memref<7x16x16xf32, #tpu.memory_space<vmem>>) attributes {dimension_semantics = [#tpu.dimension_semantics<parallel>], iteration_bounds = array<i64: 2>, scalar_prefetch = 0 : i64, scratch_operands = 0 : i64, tpu.core_type = #tpu.core_type<tc>, window_params = [{pipeline_mode = #tpu.pipeline_mode<synchronous>, transform_indices = @transform_0, window_bounds = array<i64: 16, 8>}, {pipeline_mode = #tpu.pipeline_mode<synchronous>, transform_indices = @transform_1, window_bounds = array<i64: 8, 16>}, {transform_indices = @transform_2, window_bounds = array<i64: 7, 8, 16>}, {transform_indices = @transform_3, window_bounds = array<i64: 7, 16, 16>}]} {
    %c0_i32 = arith.constant 0 : i32
    %0 = arith.index_cast %c0_i32 : i32 to index
    %c0 = arith.constant 0 : index
    %c0_0 = arith.constant 0 : index
    %1 = vector.load %arg3[%0, %c0, %c0_0] : memref<7x8x16xf32, #tpu.memory_space<vmem>>, vector<1x8x8xf32>
    %2 = vector.shape_cast %1 : vector<1x8x8xf32> to vector<8x8xf32>
    %3 = arith.truncf %2 : vector<8x8xf32> to vector<8x8xbf16>
    %c0_1 = arith.constant 0 : index
    %c0_2 = arith.constant 0 : index
    %4 = vector.load %arg2[%c0_1, %c0_2] : memref<8x16xbf16, #tpu.memory_space<vmem>>, vector<8x16xbf16>
    %cst = arith.constant dense<0.000000e+00> : vector<8x16xf32>
    %5 = tpu.matmul %3, %4, %cst {dimension_numbers = #tpu.dot_dimension_numbers<[1], [0], [0], [1], [0, 0, 1, 1], [], []>} : vector<8x8xbf16>, vector<8x16xbf16>, vector<8x16xf32> -> vector<8x16xf32>
    %c0_3 = arith.constant 0 : index
    %c0_4 = arith.constant 0 : index
    %6 = vector.load %arg1[%c0_3, %c0_4] : memref<16x8xbf16, #tpu.memory_space<vmem>>, vector<16x8xbf16>
    %7 = arith.truncf %5 : vector<8x16xf32> to vector<8x16xbf16>
    %cst_5 = arith.constant dense<0.000000e+00> : vector<16x16xf32>
    %8 = tpu.matmul %6, %7, %cst_5 {dimension_numbers = #tpu.dot_dimension_numbers<[1], [0], [0], [1], [0, 0, 1, 1], [], []>} : vector<16x8xbf16>, vector<8x16xbf16>, vector<16x16xf32> -> vector<16x16xf32>
    %9 = arith.index_cast %c0_i32 : i32 to index
    %c0_6 = arith.constant 0 : index
    %c0_7 = arith.constant 0 : index
    %10 = vector.load %arg4[%9, %c0_6, %c0_7] : memref<7x16x16xf32, #tpu.memory_space<vmem>>, vector<1x16x16xf32>
    %11 = vector.shape_cast %10 : vector<1x16x16xf32> to vector<16x16xf32>
    %12 = vector.shape_cast %8 : vector<16x16xf32> to vector<1x16x16xf32>
    tpu.vector_store %arg4[%9, %c0_6, %c0_7], %12 {strides = array<i32>} : memref<7x16x16xf32, #tpu.memory_space<vmem>>, vector<1x16x16xf32>,
    %c1_i32 = arith.constant 1 : i32
    %13 = arith.index_cast %c1_i32 : i32 to index
    %c0_8 = arith.constant 0 : index
    %c0_9 = arith.constant 0 : index
    %14 = vector.load %arg3[%13, %c0_8, %c0_9] : memref<7x8x16xf32, #tpu.memory_space<vmem>>, vector<1x8x8xf32>
    %15 = vector.shape_cast %14 : vector<1x8x8xf32> to vector<8x8xf32>
    %16 = arith.truncf %15 : vector<8x8xf32> to vector<8x8xbf16>
    %c0_10 = arith.constant 0 : index
    %c0_11 = arith.constant 0 : index
    %17 = vector.load %arg2[%c0_10, %c0_11] : memref<8x16xbf16, #tpu.memory_space<vmem>>, vector<8x16xbf16>
    %cst_12 = arith.constant dense<0.000000e+00> : vector<8x16xf32>
    %18 = tpu.matmul %16, %17, %cst_12 {dimension_numbers = #tpu.dot_dimension_numbers<[1], [0], [0], [1], [0, 0, 1, 1], [], []>} : vector<8x8xbf16>, vector<8x16xbf16>, vector<8x16xf32> -> vector<8x16xf32>
    %c0_13 = arith.constant 0 : index
    %c0_14 = arith.constant 0 : index
    %19 = vector.load %arg1[%c0_13, %c0_14] : memref<16x8xbf16, #tpu.memory_space<vmem>>, vector<16x8xbf16>
    %20 = arith.truncf %18 : vector<8x16xf32> to vector<8x16xbf16>
    %cst_15 = arith.constant dense<0.000000e+00> : vector<16x16xf32>
    %21 = tpu.matmul %19, %20, %cst_15 {dimension_numbers = #tpu.dot_dimension_numbers<[1], [0], [0], [1], [0, 0, 1, 1], [], []>} : vector<16x8xbf16>, vector<8x16xbf16>, vector<16x16xf32> -> vector<16x16xf32>
    %22 = arith.index_cast %c1_i32 : i32 to index
    %c0_16 = arith.constant 0 : index
    %c0_17 = arith.constant 0 : index
    %23 = vector.load %arg4[%22, %c0_16, %c0_17] : memref<7x16x16xf32, #tpu.memory_space<vmem>>, vector<1x16x16xf32>
    %24 = vector.shape_cast %23 : vector<1x16x16xf32> to vector<16x16xf32>
    %25 = vector.shape_cast %21 : vector<16x16xf32> to vector<1x16x16xf32>
    tpu.vector_store %arg4[%22, %c0_16, %c0_17], %25 {strides = array<i32>} : memref<7x16x16xf32, #tpu.memory_space<vmem>>, vector<1x16x16xf32>,
    %c2_i32 = arith.constant 2 : i32
    %26 = arith.index_cast %c2_i32 : i32 to index
    %c0_18 = arith.constant 0 : index
    %c0_19 = arith.constant 0 : index
    %27 = vector.load %arg3[%26, %c0_18, %c0_19] : memref<7x8x16xf32, #tpu.memory_space<vmem>>, vector<1x8x8xf32>
    %28 = vector.shape_cast %27 : vector<1x8x8xf32> to vector<8x8xf32>
    %29 = arith.truncf %28 : vector<8x8xf32> to vector<8x8xbf16>
    %c0_20 = arith.constant 0 : index
    %c0_21 = arith.constant 0 : index
    %30 = vector.load %arg2[%c0_20, %c0_21] : memref<8x16xbf16, #tpu.memory_space<vmem>>, vector<8x16xbf16>
    %cst_22 = arith.constant dense<0.000000e+00> : vector<8x16xf32>
    %31 = tpu.matmul %29, %30, %cst_22 {dimension_numbers = #tpu.dot_dimension_numbers<[1], [0], [0], [1], [0, 0, 1, 1], [], []>} : vector<8x8xbf16>, vector<8x16xbf16>, vector<8x16xf32> -> vector<8x16xf32>
    %c0_23 = arith.constant 0 : index
    %c0_24 = arith.constant 0 : index
    %32 = vector.load %arg1[%c0_23, %c0_24] : memref<16x8xbf16, #tpu.memory_space<vmem>>, vector<16x8xbf16>
    %33 = arith.truncf %31 : vector<8x16xf32> to vector<8x16xbf16>
    %cst_25 = arith.constant dense<0.000000e+00> : vector<16x16xf32>
    %34 = tpu.matmul %32, %33, %cst_25 {dimension_numbers = #tpu.dot_dimension_numbers<[1], [0], [0], [1], [0, 0, 1, 1], [], []>} : vector<16x8xbf16>, vector<8x16xbf16>, vector<16x16xf32> -> vector<16x16xf32>
    %35 = arith.index_cast %c2_i32 : i32 to index
    %c0_26 = arith.constant 0 : index
    %c0_27 = arith.constant 0 : index
    %36 = vector.load %arg4[%35, %c0_26, %c0_27] : memref<7x16x16xf32, #tpu.memory_space<vmem>>, vector<1x16x16xf32>
    %37 = vector.shape_cast %36 : vector<1x16x16xf32> to vector<16x16xf32>
    %38 = vector.shape_cast %34 : vector<16x16xf32> to vector<1x16x16xf32>
    tpu.vector_store %arg4[%35, %c0_26, %c0_27], %38 {strides = array<i32>} : memref<7x16x16xf32, #tpu.memory_space<vmem>>, vector<1x16x16xf32>,
    %c3_i32 = arith.constant 3 : i32
    %39 = arith.index_cast %c3_i32 : i32 to index
    %c0_28 = arith.constant 0 : index
    %c0_29 = arith.constant 0 : index
    %40 = vector.load %arg3[%39, %c0_28, %c0_29] : memref<7x8x16xf32, #tpu.memory_space<vmem>>, vector<1x8x8xf32>
    %41 = vector.shape_cast %40 : vector<1x8x8xf32> to vector<8x8xf32>
    %42 = arith.truncf %41 : vector<8x8xf32> to vector<8x8xbf16>
    %c0_30 = arith.constant 0 : index
    %c0_31 = arith.constant 0 : index
    %43 = vector.load %arg2[%c0_30, %c0_31] : memref<8x16xbf16, #tpu.memory_space<vmem>>, vector<8x16xbf16>
    %cst_32 = arith.constant dense<0.000000e+00> : vector<8x16xf32>
    %44 = tpu.matmul %42, %43, %cst_32 {dimension_numbers = #tpu.dot_dimension_numbers<[1], [0], [0], [1], [0, 0, 1, 1], [], []>} : vector<8x8xbf16>, vector<8x16xbf16>, vector<8x16xf32> -> vector<8x16xf32>
    %c0_33 = arith.constant 0 : index
    %c0_34 = arith.constant 0 : index
    %45 = vector.load %arg1[%c0_33, %c0_34] : memref<16x8xbf16, #tpu.memory_space<vmem>>, vector<16x8xbf16>
    %46 = arith.truncf %44 : vector<8x16xf32> to vector<8x16xbf16>
    %cst_35 = arith.constant dense<0.000000e+00> : vector<16x16xf32>
    %47 = tpu.matmul %45, %46, %cst_35 {dimension_numbers = #tpu.dot_dimension_numbers<[1], [0], [0], [1], [0, 0, 1, 1], [], []>} : vector<16x8xbf16>, vector<8x16xbf16>, vector<16x16xf32> -> vector<16x16xf32>
    %48 = arith.index_cast %c3_i32 : i32 to index
    %c0_36 = arith.constant 0 : index
    %c0_37 = arith.constant 0 : index
    %49 = vector.load %arg4[%48, %c0_36, %c0_37] : memref<7x16x16xf32, #tpu.memory_space<vmem>>, vector<1x16x16xf32>
    %50 = vector.shape_cast %49 : vector<1x16x16xf32> to vector<16x16xf32>
    %51 = vector.shape_cast %47 : vector<16x16xf32> to vector<1x16x16xf32>
    tpu.vector_store %arg4[%48, %c0_36, %c0_37], %51 {strides = array<i32>} : memref<7x16x16xf32, #tpu.memory_space<vmem>>, vector<1x16x16xf32>,
    %c4_i32 = arith.constant 4 : i32
    %52 = arith.index_cast %c4_i32 : i32 to index
    %c0_38 = arith.constant 0 : index
    %c0_39 = arith.constant 0 : index
    %53 = vector.load %arg3[%52, %c0_38, %c0_39] : memref<7x8x16xf32, #tpu.memory_space<vmem>>, vector<1x8x8xf32>
    %54 = vector.shape_cast %53 : vector<1x8x8xf32> to vector<8x8xf32>
    %55 = arith.truncf %54 : vector<8x8xf32> to vector<8x8xbf16>
    %c0_40 = arith.constant 0 : index
    %c0_41 = arith.constant 0 : index
    %56 = vector.load %arg2[%c0_40, %c0_41] : memref<8x16xbf16, #tpu.memory_space<vmem>>, vector<8x16xbf16>
    %cst_42 = arith.constant dense<0.000000e+00> : vector<8x16xf32>
    %57 = tpu.matmul %55, %56, %cst_42 {dimension_numbers = #tpu.dot_dimension_numbers<[1], [0], [0], [1], [0, 0, 1, 1], [], []>} : vector<8x8xbf16>, vector<8x16xbf16>, vector<8x16xf32> -> vector<8x16xf32>
    %c0_43 = arith.constant 0 : index
    %c0_44 = arith.constant 0 : index
    %58 = vector.load %arg1[%c0_43, %c0_44] : memref<16x8xbf16, #tpu.memory_space<vmem>>, vector<16x8xbf16>
    %59 = arith.truncf %57 : vector<8x16xf32> to vector<8x16xbf16>
    %cst_45 = arith.constant dense<0.000000e+00> : vector<16x16xf32>
    %60 = tpu.matmul %58, %59, %cst_45 {dimension_numbers = #tpu.dot_dimension_numbers<[1], [0], [0], [1], [0, 0, 1, 1], [], []>} : vector<16x8xbf16>, vector<8x16xbf16>, vector<16x16xf32> -> vector<16x16xf32>
    %61 = arith.index_cast %c4_i32 : i32 to index
    %c0_46 = arith.constant 0 : index
    %c0_47 = arith.constant 0 : index
    %62 = vector.load %arg4[%61, %c0_46, %c0_47] : memref<7x16x16xf32, #tpu.memory_space<vmem>>, vector<1x16x16xf32>
    %63 = vector.shape_cast %62 : vector<1x16x16xf32> to vector<16x16xf32>
    %64 = vector.shape_cast %60 : vector<16x16xf32> to vector<1x16x16xf32>
    tpu.vector_store %arg4[%61, %c0_46, %c0_47], %64 {strides = array<i32>} : memref<7x16x16xf32, #tpu.memory_space<vmem>>, vector<1x16x16xf32>,
    %c5_i32 = arith.constant 5 : i32
    %65 = arith.index_cast %c5_i32 : i32 to index
    %c0_48 = arith.constant 0 : index
    %c0_49 = arith.constant 0 : index
    %66 = vector.load %arg3[%65, %c0_48, %c0_49] : memref<7x8x16xf32, #tpu.memory_space<vmem>>, vector<1x8x8xf32>
    %67 = vector.shape_cast %66 : vector<1x8x8xf32> to vector<8x8xf32>
    %68 = arith.truncf %67 : vector<8x8xf32> to vector<8x8xbf16>
    %c0_50 = arith.constant 0 : index
    %c0_51 = arith.constant 0 : index
    %69 = vector.load %arg2[%c0_50, %c0_51] : memref<8x16xbf16, #tpu.memory_space<vmem>>, vector<8x16xbf16>
    %cst_52 = arith.constant dense<0.000000e+00> : vector<8x16xf32>
    %70 = tpu.matmul %68, %69, %cst_52 {dimension_numbers = #tpu.dot_dimension_numbers<[1], [0], [0], [1], [0, 0, 1, 1], [], []>} : vector<8x8xbf16>, vector<8x16xbf16>, vector<8x16xf32> -> vector<8x16xf32>
    %c0_53 = arith.constant 0 : index
    %c0_54 = arith.constant 0 : index
    %71 = vector.load %arg1[%c0_53, %c0_54] : memref<16x8xbf16, #tpu.memory_space<vmem>>, vector<16x8xbf16>
    %72 = arith.truncf %70 : vector<8x16xf32> to vector<8x16xbf16>
    %cst_55 = arith.constant dense<0.000000e+00> : vector<16x16xf32>
    %73 = tpu.matmul %71, %72, %cst_55 {dimension_numbers = #tpu.dot_dimension_numbers<[1], [0], [0], [1], [0, 0, 1, 1], [], []>} : vector<16x8xbf16>, vector<8x16xbf16>, vector<16x16xf32> -> vector<16x16xf32>
    %74 = arith.index_cast %c5_i32 : i32 to index
    %c0_56 = arith.constant 0 : index
    %c0_57 = arith.constant 0 : index
    %75 = vector.load %arg4[%74, %c0_56, %c0_57] : memref<7x16x16xf32, #tpu.memory_space<vmem>>, vector<1x16x16xf32>
    %76 = vector.shape_cast %75 : vector<1x16x16xf32> to vector<16x16xf32>
    %77 = vector.shape_cast %73 : vector<16x16xf32> to vector<1x16x16xf32>
    tpu.vector_store %arg4[%74, %c0_56, %c0_57], %77 {strides = array<i32>} : memref<7x16x16xf32, #tpu.memory_space<vmem>>, vector<1x16x16xf32>,
    %c6_i32 = arith.constant 6 : i32
    %78 = arith.index_cast %c6_i32 : i32 to index
    %c0_58 = arith.constant 0 : index
    %c0_59 = arith.constant 0 : index
    %79 = vector.load %arg3[%78, %c0_58, %c0_59] : memref<7x8x16xf32, #tpu.memory_space<vmem>>, vector<1x8x8xf32>
    %80 = vector.shape_cast %79 : vector<1x8x8xf32> to vector<8x8xf32>
    %81 = arith.truncf %80 : vector<8x8xf32> to vector<8x8xbf16>
    %c0_60 = arith.constant 0 : index
    %c0_61 = arith.constant 0 : index
    %82 = vector.load %arg2[%c0_60, %c0_61] : memref<8x16xbf16, #tpu.memory_space<vmem>>, vector<8x16xbf16>
    %cst_62 = arith.constant dense<0.000000e+00> : vector<8x16xf32>
    %83 = tpu.matmul %81, %82, %cst_62 {dimension_numbers = #tpu.dot_dimension_numbers<[1], [0], [0], [1], [0, 0, 1, 1], [], []>} : vector<8x8xbf16>, vector<8x16xbf16>, vector<8x16xf32> -> vector<8x16xf32>
    %c0_63 = arith.constant 0 : index
    %c0_64 = arith.constant 0 : index
    %84 = vector.load %arg1[%c0_63, %c0_64] : memref<16x8xbf16, #tpu.memory_space<vmem>>, vector<16x8xbf16>
    %85 = arith.truncf %83 : vector<8x16xf32> to vector<8x16xbf16>
    %cst_65 = arith.constant dense<0.000000e+00> : vector<16x16xf32>
    %86 = tpu.matmul %84, %85, %cst_65 {dimension_numbers = #tpu.dot_dimension_numbers<[1], [0], [0], [1], [0, 0, 1, 1], [], []>} : vector<16x8xbf16>, vector<8x16xbf16>, vector<16x16xf32> -> vector<16x16xf32>
    %87 = arith.index_cast %c6_i32 : i32 to index
    %c0_66 = arith.constant 0 : index
    %c0_67 = arith.constant 0 : index
    %88 = vector.load %arg4[%87, %c0_66, %c0_67] : memref<7x16x16xf32, #tpu.memory_space<vmem>>, vector<1x16x16xf32>
    %89 = vector.shape_cast %88 : vector<1x16x16xf32> to vector<16x16xf32>
    %90 = vector.shape_cast %86 : vector<16x16xf32> to vector<1x16x16xf32>
    tpu.vector_store %arg4[%87, %c0_66, %c0_67], %90 {strides = array<i32>} : memref<7x16x16xf32, #tpu.memory_space<vmem>>, vector<1x16x16xf32>,
    %c7_i32 = arith.constant 7 : i32
    return
  }
  func.func @transform_0(%arg0: i32) -> (i32, i32) {
    %c0_i32 = arith.constant 0 : i32
    %c0_i32_0 = arith.constant 0 : i32
    %c0_i32_1 = arith.constant 0 : i32
    return %c0_i32, %c0_i32_0 : i32, i32
  }
  func.func @transform_1(%arg0: i32) -> (i32, i32) {
    %c0_i32 = arith.constant 0 : i32
    %c0_i32_0 = arith.constant 0 : i32
    %c0_i32_1 = arith.constant 0 : i32
    return %c0_i32, %c0_i32_0 : i32, i32
  }
  func.func @transform_2(%arg0: i32) -> (i32, i32, i32) {
    %c0_i32 = arith.constant 0 : i32
    %c0_i32_0 = arith.constant 0 : i32
    %c0_i32_1 = arith.constant 0 : i32
    return %arg0, %c0_i32, %c0_i32_0 : i32, i32, i32
  }
  func.func @transform_3(%arg0: i32) -> (i32, i32, i32) {
    %c0_i32 = arith.constant 0 : i32
    %c0_i32_0 = arith.constant 0 : i32
    %c0_i32_1 = arith.constant 0 : i32
    return %arg0, %c0_i32, %c0_i32_0 : i32, i32, i32
  }
}

</mosaic_0001>

<bundles_post_ra>
// kernel: upper_left_crop_with_resize_back.1
= control target key start
LH: loop header
LB: loop body
LE: loop exit
PB: predicated region body
PF: predicated region fallthrough
CT: control target
= control target key end

     0   :  { %8 = vsyncpa [#allocation3], 0  ;;  %s1261_s0 = inlined_call_operand.vmem [shape: bf16[16,8], index: 0, kind: input, shape index: {}]   ;;  %s1262_s1 = inlined_call_operand.vmem [shape: bf16[8,16], index: 1, kind: input, shape index: {}]   ;;  %s1263_s2 = inlined_call_operand.hbm [shape: f32[8,16,16], index: 2, kind: input, shape index: {}]   ;;  %s1264_s3 = inlined_call_operand.hbm [shape: f32[8,16,16], index: 3, kind: output, shape index: {}]  }
   0x1   :  { %10 = vsyncpa [#allocation3 + $0x1], 0 }
   0x2   :  { %11 = vsyncpa [#allocation4], 0 }
   0x3   :  { %13 = vsyncpa [#allocation4 + $0x1], 0  ;;  %s977_s12 = smov 0   ;;  %s979_s13 = smov 0  }
   0x4   :  { %s981_s14 = smov 0   ;;  %s983_s15 = smov 0  }
   0x5 LB: > { %s998_s16 = sadd.s32 4294967295, %s948_s15   ;;  %s689_s17 = sadd.s32 4294967294, %s948_s15   ;;  %s948_s15 = sphi %s983_s15, %s1275_s15   ;;  %s944_s14 = sphi %s981_s14, %s1274_s14   ;;  %s940_s13 = sphi %s979_s13, %s1273_s13   ;;  %s936_s12 = sphi %s977_s12, %s1272_s12  }
   0x6   : > { %s1002_s18 = sadd.s32 1, %s948_s15   ;;  %s68_s19 = sadd.s32 1, %s944_s14 }
   0x7   : > { %s65_s20 = ssub.s32 %s948_s15, %s1002_s18  ;;  %p75_p0 = scmp.ne.s32.totalorder %s944_s14, %s940_s13 }
   0x8   : > { %p66_p1 = scmp.eq.s32.totalorder %s65_s20, 0  ;;  %p76_p2 = scmp.eq.s32.totalorder %s948_s15, 0 }
   0x9   : > { %p81_p3 = scmp.ne.s32.totalorder %s940_s13, %s936_s12  ;;  %p82_p4 = scmp.eq.s32.totalorder %s998_s16, 0 }
   0xa   : > { %s1014_s21 = scalar_select %p66_p1, %s944_s14, %s68_s19  }
   0xb   : > { %p77_p5 = por %p76_p2, %p75_p0  ;;  %p1016_p6 = por %p82_p4, %p81_p3 }
   0xc   : > { %p105_p7 = scmp.eq.s32.totalorder %s998_s16, 1  ;;  %p111_p8 = scmp.eq.s32.totalorder %s689_s17, 1 }
   0xd   : > { %p1265_p11 = scmp.ge.s32.totalorder %s948_s15, 2 }
   0xe   : > { %p1021_p9 = por %p105_p7, %p75_p0  ;;  %p1025_p10 = por %p111_p8, %p81_p3 }
   0xf   : > { %133 = sbr.rel (%p1265_p11) target bundleno = 59 (0x3b), region = 24 }
  0x14   : > { %136 = sbr.rel (!%p77_p5) target bundleno = 59 (0x3b), region = 28  ;;  %s137_s25 = sand.u32 (%p77_p5), 1, %s944_s14  }
  0x15   : > { %s142_s26 = smul.u32 (%p77_p5), 7, %s948_s15  ;;  %s1037_s5 = scalar_lea.sflag (%p77_p5), [#allocation3], %s137_s25 }
  0x16   : > { %s785_s27 = smul.u32 (%p77_p5), 56, %s137_s25 }
  0x17   : > { %s143_s28 = ssub.s32 (%p77_p5), 8, %s142_s26 }
  0x18   : > { %p144_p12 = scmp.lt.s32.totalorder (%p77_p5), %s143_s28, 7  ;;  %s141_s6 = scalar_lea.vmem (%p77_p5), [#allocation2], %s785_s27 }
  0x1a   : > { %s1277_s28 = smov (!%p144_p12, %s143_s28), 7 }
  0x1b   : > { %s692_s29 = sshll.u32 %s1277_s28, 3 }
  0x1c   : > { %s147_s30 = ssub.s32 56, %s692_s29 }
  0x1d   : > { %s148_s4 = sshll.u32 %s147_s30, 4 }
  0x1e   : > { %149 = vsyncadd %s1037_s5, %s148_s4  ;;  %p1040_p13 = scmp.ne.s32.totalorder %s692_s29, 0  ;;  %s783_s8 = smul.u32 112, %s948_s15 }
  0x1f   : > { %s1045_s9 = sshll.u32 %s141_s6, 4  ;;  %s697_s10 = sshll.u32 %s1277_s28, 7  ;;  %s158_s9 = int_to_ptr.vmem [resolvable:$true] %s1045_s9 }
  0x20   : > { %s153_s19 = scalar_lea.hbm %s1263_s2, %s783_s8  ;;  %s834_s26 = sshrl.u32 %s697_s10, 4 }
  0x21   : > { %s155_s20 = sshll.u32 %s153_s19, 4  ;;  %s843_s4 = scalar_lea.hbm %s1263_s2, 128  ;;  %s1052_s20 = int_to_ptr.hbm [resolvable:$true] %s155_s20 }
  0x22   : > { %s832_s25 = sshra.s32 %s1052_s20, 4  ;;  %s833_s25 = int_to_ptr.hbm [resolvable:$true] %s832_s25 }
  0x23   : > { %s839_s27 = scalar_lea.hbm %s833_s25, %s834_s26  ;;  %p844_p3 = scmp.lt.s32.totalorder %s833_s25, %s1263_s2 }
  0x24   : > { %p840_p0 = scmp.ne.s32.totalorder %s833_s25, %s839_s27  ;;  %p845_p4 = scmp.lt.s32.totalorder %s843_s4, %s839_s27 }
  0x26   : > { %p841_p1 = pnand %p840_p0, %p1040_p13  ;;  %p846_p5 = por %p845_p4, %p844_p3 }
  0x28   : > { %p842_p2 = pneg %p841_p1 }
  0x2a   : > { %p847_p7 = pnand %p846_p5, %p842_p2 }
  0x2c   : > { %850 = shalt.err (!%p847_p7)
}
  0x2d   : > { %s851_s11 = sshra.s32 %s158_s9, 4  ;;  %s950_s19 = smov [#allocation2]   ;;  %s852_s11 = int_to_ptr.vmem [resolvable:$true] %s851_s11 }
  0x2e   : > { %s858_s17 = scalar_lea.vmem %s852_s11, %s834_s26  ;;  %s862_s29 = scalar_lea.vmem %s950_s19, 112 }
  0x2f   : > { %p859_p8 = scmp.ne.s32.totalorder %s852_s11, %s858_s17  ;;  %p864_p1 = scmp.lt.s32.totalorder %s862_s29, %s858_s17 }
  0x31   : > { %p860_p12 = pnand %p859_p8, %p1040_p13 }
  0x33   : > { %p861_p0 = pneg %p860_p12 }
  0x35   : > { %p866_p11 = pnand %p864_p1, %p861_p0 }
  0x37   : > { %869 = shalt.err (!%p866_p11)
}
  0x38   : > { %s951_s25 = smov 256   ;;  %s952_s27 = smov 128  }
  0x39   : > { %s953_s30 = smov 8  }
  0x3a   : > { %163 = dma.hbm_to_vmem [thread:$0]  (%p1040_p13), %s1052_s20, %s697_s10, %s158_s9, %s1037_s5, %s951_s25, %s952_s27, %s953_s30  }
  0x3b PF: > { %p698_p2 = scmp.ge.s32.totalorder %s948_s15, 1  ;;  %p165_p3 = scmp.lt.s32.totalorder %s948_s15, 3 }
  0x3d   : > { %p166_p4 = pnand %p698_p2, %p165_p3 }
  0x3e   : > { %s1080_s26 = sand.u32 (!%p166_p4), 1, %s940_s13  }
  0x3f   : > { %169 = sbr.rel (%p166_p4) target bundleno = 420 (0x1a4), region = 32  ;;  %s172_s6 = scalar_lea.sflag (!%p166_p4), [#allocation3], %s1080_s26 }
  0x40   : > { %s786_s4 = smul.u32 (!%p166_p4), 56, %s1080_s26 }
  0x42   : > { %s1084_s7 = scalar_lea.vmem (!%p166_p4), [#allocation2], %s786_s4 }
  0x44   : > { %927 = dma.done.wait (%p1016_p6), %s172_s6, 896  }
  0x45   : > { %929 = vsyncadd (%p1016_p6), %s172_s6, 4294966400  ;;  %vm218_vm0 = vcmask 1043456   ;;  %v213_v0 = vld [vmem:[%s1262_s1] sm:$0xf]  ;;  %vm214_vm1 = vcmask 64512   ;;  %v714_v16 = vld [vmem:[%s1084_s7 + $0x10] sm:$0xff] }
  0x46   : > { %v269_v1 = vld [vmem:[%s1262_s1] sm:$0xf]  ;;  %v220_v3 = vsel %vm218_vm0, %v213_v0, 0  ;;  %v723_v17 = vld [vmem:[%s1084_s7 + $0x18] sm:$0xff]  ;;  %v322_v19 = vpack.c.bf16 %v714_v16, %v714_v16  ;;  %v750_v26 = vld [vmem:[%s1084_s7 + $0x30] sm:$0xff]  ;;  %s787_s25 = smul.u32 112, %s1080_s26 }
  0x47   : > { %v211_v2 = vld [vmem:[%s1084_s7] sm:$0xff]  ;;  %v274_v4 = vsel %vm218_vm0, %v269_v1, 0  ;;  %v705_v6 = vld [vmem:[%s1084_s7 + $0x8] sm:$0xff]  ;;  %229 = vmatpush.bf16.msra.mxu0 %v220_v3  ;;  %v376_v20 = vpack.c.bf16 %v723_v17, %v723_v17  ;;  %v538_v27 = vpack.c.bf16 %v750_v26, %v750_v26  ;;  %vm263_vm2 = vcmask 130048   ;;  %s591_s30 = scalar_lea.sflag [#allocation4], %s1080_s26  ;;  %s598_s4 = smul.u32 (%p1021_p9), 7, %s998_s16 }
  0x48   : > { %v212_v5 = vpack.c.bf16 %v211_v2, %v211_v2  ;;  %v323_v7 = vld [vmem:[%s1262_s1] sm:$0xf]  ;;  %283 = vmatpush.bf16.msra.mxu2 %v274_v4  ;;  %v268_v8 = vpack.c.bf16 %v705_v6, %v705_v6  ;;  %s1168_s27 = scalar_lea.vmem [#allocation5], %s787_s25 }
  0x49   : > { %v328_v9 = vsel %vm218_vm0, %v323_v7, 0  ;;  %v377_v10 = vld [vmem:[%s1262_s1] sm:$0xf]  ;;  %s599_s6 = ssub.s32 (%p1021_p9), 8, %s598_s4 }
  0x4a   : > { %v431_v11 = vld [vmem:[%s1262_s1] sm:$0xf]  ;;  %v382_v12 = vsel %vm218_vm0, %v377_v10, 0  ;;  %699 = vmatmul.msk.bf16.vlgmr.msra.gmra.mxu0 %vm214_vm1, %v212_v5  ;;  %p600_p6 = scmp.lt.s32.totalorder (%p1021_p9), %s599_s6, 7 }
  0x4b   : > { %337 = vmatpush.bf16.msrb.mxu0 %v328_v9  ;;  %v436_v13 = vsel %vm218_vm0, %v431_v11, 0  ;;  %v485_v14 = vld [vmem:[%s1262_s1] sm:$0xf]  ;;  %706 = vmatmul.msk.bf16.vlgmr.msra.gmra.mxu2 %vm214_vm1, %v268_v8 }
  0x4c   : > { %391 = vmatpush.bf16.msrb.mxu2 %v382_v12  ;;  %v490_v15 = vsel %vm218_vm0, %v485_v14, 0  ;;  %v539_v18 = vld [vmem:[%s1262_s1] sm:$0xf] }
  0x4d   : > { %v544_v21 = vsel %vm218_vm0, %v539_v18, 0  ;;  %v732_v22 = vld [vmem:[%s1084_s7 + $0x20] sm:$0xff]  ;;  %v741_v23 = vld [vmem:[%s1084_s7 + $0x28] sm:$0xff] }
  0x4e   : > { %v430_v24 = vpack.c.bf16 %v732_v22, %v732_v22  ;;  %v484_v25 = vpack.c.bf16 %v741_v23, %v741_v23  ;;  %v771_v31 = vld [vmem:[%s1261_s0] sm:$0xff] }
  0x4f   : > { %445 = vmatpush.bf16.msra.mxu0 %v436_v13  ;;  %v772_v36 = vld [vmem:[%s1261_s0] sm:$0xff] }
  0x50   : > { %499 = vmatpush.bf16.msra.mxu2 %v490_v15  ;;  %v773_v41 = vld [vmem:[%s1261_s0] sm:$0xff] }
  0x51   : > { %v774_v46 = vld [vmem:[%s1261_s0] sm:$0xff] }
  0x52   : > { %v775_v51 = vld [vmem:[%s1261_s0] sm:$0xff] }
  0x53   : > { %v776_v56 = vld [vmem:[%s1261_s0] sm:$0xff] }
  0x54   : > { %v777_v61 = vld [vmem:[%s1261_s0] sm:$0xff] }
  0x5a   : > { %715 = vmatmul.msk.bf16.vlgmr.msrb.gmra.mxu0 %vm214_vm1, %v322_v19 }
  0x5b   : > { %724 = vmatmul.msk.bf16.vlgmr.msrb.gmra.mxu2 %vm214_vm1, %v376_v20  ;;  %553 = vmatpush.bf16.msrb.mxu0 %v544_v21 }
  0x6a   : > { %733 = vmatmul.msk.bf16.vlgmr.msra.gmra.mxu0 %vm214_vm1, %v430_v24 }
  0x6b   : > { %742 = vmatmul.msk.bf16.vlgmr.msra.gmra.mxu2 %vm214_vm1, %v484_v25 }
  0x7a   : > { %751 = vmatmul.msk.bf16.vlgmr.msrb.gmra.mxu0 %vm214_vm1, %v538_v27 }
  0xc7   : > { %v231_v28 = vpop.f32.mrf.mxu0 }
  0xc8   : > { %v237_v29 = vpack.c.bf16 %v231_v28, %v231_v28 }
  0xca   : > { %v247_v30 = vsel %vm218_vm0, %v237_v29, 0 }
  0xcb   : > { %256 = vmatpush.bf16.msra.mxu1 %v247_v30 }
  0xce   : > { %v285_v32 = vpop.f32.mrf.mxu2  ;;  %704 = vmatmul.msk.bf16.vlgmr.msra.gmra.mxu1 %vm214_vm1, %v771_v31 }
  0xcf   : > { %v291_v33 = vpack.c.bf16 %v285_v32, %v285_v32  ;;  %v233_v34 = vpop.f32.mrf.mxu0 }
  0xd1   : > { %v301_v35 = vsel %vm218_vm0, %v291_v33, 0 }
  0xd2   : > { %310 = vmatpush.bf16.msra.mxu3 %v301_v35 }
  0xd5   : > { %711 = vmatmul.msk.bf16.vlgmr.msra.gmra.mxu3 %vm214_vm1, %v772_v36 }
  0xd6   : > { %v287_v37 = vpop.f32.mrf.mxu2 }
  0xd7   : > { %v339_v38 = vpop.f32.mrf.mxu0 }
  0xd8   : > { %v345_v39 = vpack.c.bf16 %v339_v38, %v339_v38 }
  0xda   : > { %v355_v40 = vsel %vm218_vm0, %v345_v39, 0 }
  0xdb   : > { %364 = vmatpush.bf16.msrb.mxu1 %v355_v40 }
  0xde   : > { %v393_v42 = vpop.f32.mrf.mxu2  ;;  %720 = vmatmul.msk.bf16.vlgmr.msrb.gmra.mxu1 %vm214_vm1, %v773_v41 }
  0xdf   : > { %v399_v43 = vpack.c.bf16 %v393_v42, %v393_v42  ;;  %v341_v44 = vpop.f32.mrf.mxu0 }
  0xe1   : > { %v409_v45 = vsel %vm218_vm0, %v399_v43, 0 }
  0xe2   : > { %418 = vmatpush.bf16.msrb.mxu3 %v409_v45 }
  0xe5   : > { %729 = vmatmul.msk.bf16.vlgmr.msrb.gmra.mxu3 %vm214_vm1, %v774_v46 }
  0xe6   : > { %v395_v47 = vpop.f32.mrf.mxu2 }
  0xe7   : > { %v447_v48 = vpop.f32.mrf.mxu0 }
  0xe8   : > { %v453_v49 = vpack.c.bf16 %v447_v48, %v447_v48 }
  0xea   : > { %v463_v50 = vsel %vm218_vm0, %v453_v49, 0 }
  0xeb   : > { %472 = vmatpush.bf16.msra.mxu1 %v463_v50 }
  0xee   : > { %v501_v52 = vpop.f32.mrf.mxu2  ;;  %738 = vmatmul.msk.bf16.vlgmr.msra.gmra.mxu1 %vm214_vm1, %v775_v51 }
  0xef   : > { %v507_v53 = vpack.c.bf16 %v501_v52, %v501_v52  ;;  %v449_v54 = vpop.f32.mrf.mxu0 }
  0xf1   : > { %v517_v55 = vsel %vm218_vm0, %v507_v53, 0 }
  0xf2   : > { %526 = vmatpush.bf16.msra.mxu3 %v517_v55 }
  0xf5   : > { %747 = vmatmul.msk.bf16.vlgmr.msra.gmra.mxu3 %vm214_vm1, %v776_v56 }
  0xf6   : > { %v503_v57 = vpop.f32.mrf.mxu2 }
  0xf7   : > { %v555_v58 = vpop.f32.mrf.mxu0 }
  0xf8   : > { %v561_v59 = vpack.c.bf16 %v555_v58, %v555_v58 }
  0xfa   : > { %v571_v60 = vsel %vm218_vm0, %v561_v59, 0 }
  0xfb   : > { %580 = vmatpush.bf16.msrb.mxu1 %v571_v60 }
  0xfe   : > { %756 = vmatmul.msk.bf16.vlgmr.msrb.gmra.mxu1 %vm214_vm1, %v777_v61 }
  0xff   : > { %v557_v62 = vpop.f32.mrf.mxu0 }
 0x14b   : > { %v258_v63 = vpop.f32.mrf.mxu1 }
 0x14c   : > { %264 = vst.msk [vmem:[%s1168_s27] sm:$0xff] %vm263_vm2, %v258_v63 }
 0x153   : > { %v260_v0 = vpop.f32.mrf.mxu1 }
 0x154   : > { %265 = vst.msk [vmem:[%s1168_s27 + $0x8] sm:$0xff] %vm263_vm2, %v260_v0 }
 0x158   : > { %v312_v1 = vpop.f32.mrf.mxu3 }
 0x159   : > { %712 = vst.msk [vmem:[%s1168_s27 + $0x10] sm:$0xff] %vm263_vm2, %v312_v1 }
 0x15b   : > { %v366_v2 = vpop.f32.mrf.mxu1 }
 0x15c   : > { %721 = vst.msk [vmem:[%s1168_s27 + $0x20] sm:$0xff] %vm263_vm2, %v366_v2 }
 0x160   : > { %v314_v3 = vpop.f32.mrf.mxu3 }
 0x161   : > { %713 = vst.msk [vmem:[%s1168_s27 + $0x18] sm:$0xff] %vm263_vm2, %v314_v3 }
 0x163   : > { %v368_v4 = vpop.f32.mrf.mxu1 }
 0x164   : > { %722 = vst.msk [vmem:[%s1168_s27 + $0x28] sm:$0xff] %vm263_vm2, %v368_v4 }
 0x168   : > { %v420_v5 = vpop.f32.mrf.mxu3 }
 0x169   : > { %730 = vst.msk [vmem:[%s1168_s27 + $0x30] sm:$0xff] %vm263_vm2, %v420_v5 }
 0x16b   : > { %v474_v6 = vpop.f32.mrf.mxu1 }
 0x16c   : > { %739 = vst.msk [vmem:[%s1168_s27 + $0x40] sm:$0xff] %vm263_vm2, %v474_v6 }
 0x170   : > { %v422_v7 = vpop.f32.mrf.mxu3 }
 0x171   : > { %731 = vst.msk [vmem:[%s1168_s27 + $0x38] sm:$0xff] %vm263_vm2, %v422_v7 }
 0x173   : > { %v476_v8 = vpop.f32.mrf.mxu1 }
 0x174   : > { %740 = vst.msk [vmem:[%s1168_s27 + $0x48] sm:$0xff] %vm263_vm2, %v476_v8 }
 0x178   : > { %v528_v9 = vpop.f32.mrf.mxu3 }
 0x179   : > { %748 = vst.msk [vmem:[%s1168_s27 + $0x50] sm:$0xff] %vm263_vm2, %v528_v9 }
 0x17b   : > { %v582_v10 = vpop.f32.mrf.mxu1 }
 0x17c   : > { %757 = vst.msk [vmem:[%s1168_s27 + $0x60] sm:$0xff] %vm263_vm2, %v582_v10 }
 0x180   : > { %v530_v11 = vpop.f32.mrf.mxu3  ;;  %597 = sbr.rel (!%p1021_p9) target bundleno = 420 (0x1a4), region = 40 }
 0x181   : > { %749 = vst.msk [vmem:[%s1168_s27 + $0x58] sm:$0xff] %vm263_vm2, %v530_v11 }
 0x183   : > { %v584_v12 = vpop.f32.mrf.mxu1 }
 0x184   : > { %758 = vst.msk [vmem:[%s1168_s27 + $0x68] sm:$0xff] %vm263_vm2, %v584_v12 }
 0x185   : > { %s1279_s6 = smov (!%p600_p6, %s599_s6), 7 }
 0x186   : > { %s778_s7 = sshll.u32 %s1279_s6, 4 }
 0x187   : > { %s604_s28 = ssub.s32 112, %s778_s7 }
 0x188   : > { %s605_s5 = sshll.u32 %s604_s28, 4 }
 0x189   : > { %606 = vsyncadd %s591_s30, %s605_s5  ;;  %p1207_p11 = scmp.ne.s32.totalorder %s778_s7, 0  ;;  %s784_s9 = smul.u32 112, %s998_s16 }
 0x18a   : > { %s613_s10 = sshll.u32 %s1168_s27, 4  ;;  %s782_s22 = sshll.u32 %s1279_s6, 8  ;;  %s1217_s10 = int_to_ptr.vmem [resolvable:$true] %s613_s10 }
 0x18b   : > { %s610_s11 = scalar_lea.hbm %s1264_s3, %s784_s9  ;;  %s871_s19 = sshra.s32 %s1217_s10, 4  ;;  %s872_s19 = int_to_ptr.vmem [resolvable:$true] %s871_s19 }
 0x18c   : > { %s615_s17 = sshll.u32 %s610_s11, 4  ;;  %s873_s29 = sshrl.u32 %s782_s22, 4  ;;  %s1219_s17 = int_to_ptr.hbm [resolvable:$true] %s615_s17 }
 0x18d   : > { %s878_s25 = scalar_lea.vmem %s872_s19, %s873_s29  ;;  %s954_s16 = smov [#allocation5]  }
 0x18e   : > { %p879_p9 = scmp.ne.s32.totalorder %s872_s19, %s878_s25  ;;  %s882_s27 = scalar_lea.vmem %s954_s16, 224 }
 0x18f   : > { %p884_p7 = scmp.lt.s32.totalorder %s882_s27, %s878_s25 }
 0x190   : > { %p880_p13 = pnand %p879_p9, %p1207_p11 }
 0x192   : > { %p881_p5 = pneg %p880_p13 }
 0x194   : > { %p886_p8 = pnand %p884_p7, %p881_p5 }
 0x196   : > { %889 = shalt.err (!%p886_p8)
}
 0x197   : > { %s890_s4 = sshra.s32 %s1219_s17, 4  ;;  %s901_s9 = scalar_lea.hbm %s1264_s3, 128  ;;  %s891_s4 = int_to_ptr.hbm [resolvable:$true] %s890_s4 }
 0x198   : > { %s897_s7 = scalar_lea.hbm %s891_s4, %s873_s29  ;;  %p902_p2 = scmp.lt.s32.totalorder %s891_s4, %s1264_s3 }
 0x199   : > { %p898_p12 = scmp.ne.s32.totalorder %s891_s4, %s897_s7  ;;  %p903_p3 = scmp.lt.s32.totalorder %s901_s9, %s897_s7 }
 0x19b   : > { %p899_p0 = pnand %p898_p12, %p1207_p11  ;;  %p904_p4 = por %p903_p3, %p902_p2 }
 0x19d   : > { %p900_p1 = pneg %p899_p0 }
 0x19f   : > { %p905_p6 = pnand %p904_p4, %p900_p1 }
 0x1a1   : > { %908 = shalt.err (!%p905_p6)
}
 0x1a2   : > { %s955_s11 = smov 128   ;;  %s956_s19 = smov 8  }
 0x1a3   : > { %621 = dma.vmem_to_hbm [thread:$0]  (%p1207_p11), %s1217_s10, %s782_s22, %s1219_s17, %s591_s30, %s955_s11, %s955_s11, %s956_s19  }
 0x1a4 PF: > { %s630_s29 = sand.u32 1, %s936_s12   ;;  %p1271_p9 = scmp.ge.s32.totalorder %s948_s15, 2 }
 0x1a5   : > { %s631_s25 = scalar_lea.sflag [#allocation4], %s630_s29 }
 0x1a6   : > { %p791_p13 = pnand %p1271_p9, %p1025_p10 }
 0x1a8   : > { %p792_p5 = pneg %p791_p13 }
 0x1aa   : > { %931 = dma.done.wait (%p792_p5), %s631_s25, 1792  }
 0x1ab   : > { %933 = vsyncadd (%p792_p5), %s631_s25, 4294965504  ;;  %p16_p7 = scmp.ge.s32.totalorder %s1002_s18, 4   ;;  %s1272_s12 = smov %s940_s13 }
 0x1ac   : > { %s1273_s13 = smov %s944_s14  ;;  %s1274_s14 = smov %s1014_s21 }
 0x1ad   : > { %s1275_s15 = smov %s1002_s18  ;;  %18 = sbr.rel (!%p16_p7) target bundleno = 5 (0x5), region = 89 }
 0x1b2   :  { %637 = vsyncpa [#allocation3], 1 }
 0x1b3   :  { %639 = vsyncpa [#allocation3 + $0x1], 1 }
 0x1b4   :  { %640 = vsyncpa [#allocation4], 1 }
 0x1b5   :  { %642 = vsyncpa [#allocation4 + $0x1], 1 }

</bundles_post_ra>
